<compile_context>
chip_gen: v5e
topology: v5e:2x2
jax: 0.10.0
libtpu: 0.0.40
codegen_flags: <defaults>
</compile_context>

<pallas_src>
import functools

import jax
import jax.numpy as jnp
from jax.experimental import pallas as pl
from jax.experimental.pallas import tpu as pltpu

_LANE = 128
_SUBLANE = 8


def _round_up(x, m):
    return ((x + m - 1) // m) * m


def _pad2d(a, rows, cols):
    return jnp.pad(a, ((0, rows - a.shape[0]), (0, cols - a.shape[1])))


# ----------------------------------------------------------------------------
# Kernel
# ----------------------------------------------------------------------------
def _policy_kernel(x_ref,
                   w1_ref, b1_ref, w2_ref, b2_ref,
                   w3_ref, b3_ref, w4_ref, b4_ref,
                   wh_ref, bh_ref,
                   out_ref,
                   *, num_actions, log_std_min, log_std_max):
    x = x_ref[...]

    # 4 hidden Linear + ReLU layers (MXU matmuls, f32 accumulate).
    h = jnp.maximum(
        jnp.dot(x, w1_ref[...], preferred_element_type=jnp.float32) + b1_ref[...], 0.0)
    h = jnp.maximum(
        jnp.dot(h, w2_ref[...], preferred_element_type=jnp.float32) + b2_ref[...], 0.0)
    h = jnp.maximum(
        jnp.dot(h, w3_ref[...], preferred_element_type=jnp.float32) + b3_ref[...], 0.0)
    h = jnp.maximum(
        jnp.dot(h, w4_ref[...], preferred_element_type=jnp.float32) + b4_ref[...], 0.0)

    # Fused heads: columns [0, A) = mean, [A, 2A) = log_std, rest = zero padding.
    out = jnp.dot(h, wh_ref[...], preferred_element_type=jnp.float32) + bh_ref[...]

    # Clamp only the log_std columns (mean columns pass through unchanged).
    col = jax.lax.broadcasted_iota(jnp.int32, out.shape, 1)
    is_log_std = (col >= num_actions) & (col < 2 * num_actions)
    out = jnp.where(is_log_std, jnp.clip(out, log_std_min, log_std_max), out)

    out_ref[...] = out.astype(out_ref.dtype)


# ----------------------------------------------------------------------------
# Parameter prep: pad to lane-dense shapes, fuse heads (done once, outside fwd).
# ----------------------------------------------------------------------------
def pad_and_fuse_params(params):
    num_inputs, hidden = params["w1"].shape
    num_actions = params["wm"].shape[1]
    in_pad = _round_up(num_inputs, _LANE)
    h_pad = _round_up(hidden, _LANE)
    out_pad = _round_up(2 * num_actions, _LANE)

    wh = jnp.concatenate([params["wm"], params["ws"]], axis=1)   # (hidden, 2A)
    bh = jnp.concatenate([params["bm"], params["bs"]], axis=1)   # (1, 2A)

    padded = {
        "w1": _pad2d(params["w1"], in_pad, h_pad), "b1": _pad2d(params["b1"], 1, h_pad),
        "w2": _pad2d(params["w2"], h_pad, h_pad),  "b2": _pad2d(params["b2"], 1, h_pad),
        "w3": _pad2d(params["w3"], h_pad, h_pad),  "b3": _pad2d(params["b3"], 1, h_pad),
        "w4": _pad2d(params["w4"], h_pad, h_pad),  "b4": _pad2d(params["b4"], 1, h_pad),
        "wh": _pad2d(wh, h_pad, out_pad),          "bh": _pad2d(bh, 1, out_pad),
    }
    meta = {"num_inputs": num_inputs, "num_actions": num_actions,
            "in_pad": in_pad, "h_pad": h_pad, "out_pad": out_pad}
    return padded, meta


# ----------------------------------------------------------------------------
# Wrapper
# ----------------------------------------------------------------------------
def policy_network_forward(state, padded, meta, *,
                           log_std_min=-20.0, log_std_max=2.0, batch_tile=512):
    """Returns (mean, log_std), matching PolicyNetwork.forward."""
    B = state.shape[0]
    A = meta["num_actions"]
    in_pad, h_pad, out_pad = meta["in_pad"], meta["h_pad"], meta["out_pad"]

    # Batch tile: multiple of 8 sublanes, capped for VMEM headroom on all gens.
    tb = min(batch_tile, _round_up(B, _SUBLANE))
    b_pad = _round_up(B, tb)

    x = jnp.pad(state.astype(jnp.float32),
                ((0, b_pad - B), (0, in_pad - state.shape[1])))

    args = (
        x,
        padded["w1"], padded["b1"], padded["w2"], padded["b2"],
        padded["w3"], padded["b3"], padded["w4"], padded["b4"],
        padded["wh"], padded["bh"],
    )

    def _resident(shape):
        # Weights/biases stay VMEM-resident across the batch grid.
        return pl.BlockSpec(shape, lambda i: (0, 0))

    in_specs = [pl.BlockSpec((tb, in_pad), lambda i: (i, 0))]
    in_specs += [_resident(a.shape) for a in args[1:]]
    out_specs = pl.BlockSpec((tb, out_pad), lambda i: (i, 0))

    flops = 2 * b_pad * (in_pad * h_pad + 3 * h_pad * h_pad + h_pad * out_pad)
    bytes_accessed = int(sum(int(a.size) * a.dtype.itemsize for a in args)
                         + b_pad * out_pad * 4)

    kernel = functools.partial(
        _policy_kernel, num_actions=A,
        log_std_min=log_std_min, log_std_max=log_std_max)

    out = pl.pallas_call(
        kernel,
        out_shape=jax.ShapeDtypeStruct((b_pad, out_pad), jnp.float32),
        grid=(b_pad // tb,),
        in_specs=in_specs,
        out_specs=out_specs,
        compiler_params=pltpu.CompilerParams(
            dimension_semantics=("parallel",),
            vmem_limit_bytes=32 * 1024 * 1024),
        cost_estimate=pl.CostEstimate(
            flops=flops, transcendentals=0, bytes_accessed=bytes_accessed),
    )(*args)

    mean = out[:B, :A]
    log_std = out[:B, A:2 * A]
    return mean, log_std


# ----------------------------------------------------------------------------
# Init (PyTorch-equivalent layout) + plain-JAX reference
# ----------------------------------------------------------------------------
def init_policy_params(key, num_inputs, num_actions, hidden_size, init_w=0.003):
    ks = jax.random.split(key, 12)

    def linear_init(kw, kb, fan_in, fan_out):
        bound = 1.0 / jnp.sqrt(jnp.float32(fan_in))
        w = jax.random.uniform(kw, (fan_in, fan_out), jnp.float32, -bound, bound)
        b = jax.random.uniform(kb, (1, fan_out), jnp.float32, -bound, bound)
        return w, b

    def head_init(kw, kb, fan_in, fan_out, w0):
        w = jax.random.uniform(kw, (fan_in, fan_out), jnp.float32, -w0, w0)
        b = jax.random.uniform(kb, (1, fan_out), jnp.float32, -w0, w0)
        return w, b

    w1, b1 = linear_init(ks[0], ks[1], num_inputs, hidden_size)
    w2, b2 = linear_init(ks[2], ks[3], hidden_size, hidden_size)
    w3, b3 = linear_init(ks[4], ks[5], hidden_size, hidden_size)
    w4, b4 = linear_init(ks[6], ks[7], hidden_size, hidden_size)
    wm, bm = head_init(ks[8], ks[9], hidden_size, num_actions, init_w)
    ws, bs = head_init(ks[10], ks[11], hidden_size, num_actions, init_w)

    return {"w1": w1, "b1": b1, "w2": w2, "b2": b2,
            "w3": w3, "b3": b3, "w4": w4, "b4": b4,
            "wm": wm, "bm": bm, "ws": ws, "bs": bs}


def _reference_forward(state, params, log_std_min=-20.0, log_std_max=2.0):
    h = jnp.maximum(state @ params["w1"] + params["b1"], 0.0)
    h = jnp.maximum(h @ params["w2"] + params["b2"], 0.0)
    h = jnp.maximum(h @ params["w3"] + params["b3"], 0.0)
    h = jnp.maximum(h @ params["w4"] + params["b4"], 0.0)
    mean = h @ params["wm"] + params["bm"]
    log_std = jnp.clip(h @ params["ws"] + params["bs"], log_std_min, log_std_max)
    return mean, log_std


# TODO(synk): get_action's Normal sampling / tanh squashing is outside forward()
#             and is left to the caller (trivial jnp post-processing of mean/log_std).

if __name__ == "__main__":
    key = jax.random.PRNGKey(0)
    k_params, k_state1, k_state2 = jax.random.split(key, 3)

    batch = 8
    num_inputs = 16
    num_actions = 4
    hidden_size = 32

    params = init_policy_params(k_params, num_inputs, num_actions, hidden_size)
    padded, meta = pad_and_fuse_params(params)

    # Case 1: small aligned batch.
    state = jax.random.normal(k_state1, (batch, num_inputs), jnp.float32)
    mean, log_std = policy_network_forward(state, padded, meta)
    jax.block_until_ready((mean, log_std))

    mean_ref, log_std_ref = _reference_forward(state, params)
    assert mean.shape == (batch, num_actions)
    assert log_std.shape == (batch, num_actions)
    assert jnp.allclose(mean, mean_ref, atol=1e-5)
    assert jnp.allclose(log_std, log_std_ref, atol=1e-5)

    # Case 2: ragged batch (exercises batch padding + slicing path).
    state2 = jax.random.normal(k_state2, (20, num_inputs), jnp.float32)
    mean2, log_std2 = policy_network_forward(state2, padded, meta)
    jax.block_until_ready((mean2, log_std2))
    mean2_ref, log_std2_ref = _reference_forward(state2, params)
    assert jnp.allclose(mean2, mean2_ref, atol=1e-5)
    assert jnp.allclose(log_std2, log_std2_ref, atol=1e-5)

    print("KERNEL_OK")
</pallas_src>

<mosaic_0001>
module attributes {stable_mosaic.version = 11 : i64} {
  func.func @_policy_kernel(%arg0: i32, %arg1: memref<8x128xf32, #tpu.memory_space<vmem>>, %arg2: memref<128x128xf32, #tpu.memory_space<vmem>>, %arg3: memref<1x128xf32, #tpu.memory_space<vmem>>, %arg4: memref<128x128xf32, #tpu.memory_space<vmem>>, %arg5: memref<1x128xf32, #tpu.memory_space<vmem>>, %arg6: memref<128x128xf32, #tpu.memory_space<vmem>>, %arg7: memref<1x128xf32, #tpu.memory_space<vmem>>, %arg8: memref<128x128xf32, #tpu.memory_space<vmem>>, %arg9: memref<1x128xf32, #tpu.memory_space<vmem>>, %arg10: memref<128x128xf32, #tpu.memory_space<vmem>>, %arg11: memref<1x128xf32, #tpu.memory_space<vmem>>, %arg12: memref<8x128xf32, #tpu.memory_space<vmem>>) attributes {dimension_semantics = [#tpu.dimension_semantics<parallel>], iteration_bounds = array<i64: 1>, scalar_prefetch = 0 : i64, scratch_operands = 0 : i64, tpu.core_type = #tpu.core_type<tc>, window_params = [{transform_indices = @transform_0, window_bounds = array<i64: 8, 128>}, {pipeline_mode = #tpu.pipeline_mode<synchronous>, transform_indices = @transform_1, window_bounds = array<i64: 128, 128>}, {pipeline_mode = #tpu.pipeline_mode<synchronous>, transform_indices = @transform_2, window_bounds = array<i64: 1, 128>}, {pipeline_mode = #tpu.pipeline_mode<synchronous>, transform_indices = @transform_3, window_bounds = array<i64: 128, 128>}, {pipeline_mode = #tpu.pipeline_mode<synchronous>, transform_indices = @transform_4, window_bounds = array<i64: 1, 128>}, {pipeline_mode = #tpu.pipeline_mode<synchronous>, transform_indices = @transform_5, window_bounds = array<i64: 128, 128>}, {pipeline_mode = #tpu.pipeline_mode<synchronous>, transform_indices = @transform_6, window_bounds = array<i64: 1, 128>}, {pipeline_mode = #tpu.pipeline_mode<synchronous>, transform_indices = @transform_7, window_bounds = array<i64: 128, 128>}, {pipeline_mode = #tpu.pipeline_mode<synchronous>, transform_indices = @transform_8, window_bounds = array<i64: 1, 128>}, {pipeline_mode = #tpu.pipeline_mode<synchronous>, transform_indices = @transform_9, window_bounds = array<i64: 128, 128>}, {pipeline_mode = #tpu.pipeline_mode<synchronous>, transform_indices = @transform_10, window_bounds = array<i64: 1, 128>}, {transform_indices = @transform_11, window_bounds = array<i64: 8, 128>}]} {
    %c0 = arith.constant 0 : index
    %c0_0 = arith.constant 0 : index
    %0 = vector.load %arg1[%c0, %c0_0] : memref<8x128xf32, #tpu.memory_space<vmem>>, vector<8x128xf32>
    %c0_1 = arith.constant 0 : index
    %c0_2 = arith.constant 0 : index
    %1 = vector.load %arg2[%c0_1, %c0_2] : memref<128x128xf32, #tpu.memory_space<vmem>>, vector<128x128xf32>
    %cst = arith.constant dense<0.000000e+00> : vector<8x128xf32>
    %2 = tpu.matmul %0, %1, %cst {dimension_numbers = #tpu.dot_dimension_numbers<[1], [0], [0], [1], [0, 0, 1, 1], [], []>} : vector<8x128xf32>, vector<128x128xf32>, vector<8x128xf32> -> vector<8x128xf32>
    %c0_3 = arith.constant 0 : index
    %c0_4 = arith.constant 0 : index
    %3 = vector.load %arg3[%c0_3, %c0_4] : memref<1x128xf32, #tpu.memory_space<vmem>>, vector<1x128xf32>
    %4 = vector.broadcast %3 : vector<1x128xf32> to vector<8x128xf32>
    %5 = arith.addf %2, %4 : vector<8x128xf32>
    %cst_5 = arith.constant 0.000000e+00 : f32
    %6 = vector.broadcast %cst_5 : f32 to vector<8x128xf32>
    %7 = arith.maximumf %5, %6 : vector<8x128xf32>
    %c0_6 = arith.constant 0 : index
    %c0_7 = arith.constant 0 : index
    %8 = vector.load %arg4[%c0_6, %c0_7] : memref<128x128xf32, #tpu.memory_space<vmem>>, vector<128x128xf32>
    %cst_8 = arith.constant dense<0.000000e+00> : vector<8x128xf32>
    %9 = tpu.matmul %7, %8, %cst_8 {dimension_numbers = #tpu.dot_dimension_numbers<[1], [0], [0], [1], [0, 0, 1, 1], [], []>} : vector<8x128xf32>, vector<128x128xf32>, vector<8x128xf32> -> vector<8x128xf32>
    %c0_9 = arith.constant 0 : index
    %c0_10 = arith.constant 0 : index
    %10 = vector.load %arg5[%c0_9, %c0_10] : memref<1x128xf32, #tpu.memory_space<vmem>>, vector<1x128xf32>
    %11 = vector.broadcast %10 : vector<1x128xf32> to vector<8x128xf32>
    %12 = arith.addf %9, %11 : vector<8x128xf32>
    %cst_11 = arith.constant 0.000000e+00 : f32
    %13 = vector.broadcast %cst_11 : f32 to vector<8x128xf32>
    %14 = arith.maximumf %12, %13 : vector<8x128xf32>
    %c0_12 = arith.constant 0 : index
    %c0_13 = arith.constant 0 : index
    %15 = vector.load %arg6[%c0_12, %c0_13] : memref<128x128xf32, #tpu.memory_space<vmem>>, vector<128x128xf32>
    %cst_14 = arith.constant dense<0.000000e+00> : vector<8x128xf32>
    %16 = tpu.matmul %14, %15, %cst_14 {dimension_numbers = #tpu.dot_dimension_numbers<[1], [0], [0], [1], [0, 0, 1, 1], [], []>} : vector<8x128xf32>, vector<128x128xf32>, vector<8x128xf32> -> vector<8x128xf32>
    %c0_15 = arith.constant 0 : index
    %c0_16 = arith.constant 0 : index
    %17 = vector.load %arg7[%c0_15, %c0_16] : memref<1x128xf32, #tpu.memory_space<vmem>>, vector<1x128xf32>
    %18 = vector.broadcast %17 : vector<1x128xf32> to vector<8x128xf32>
    %19 = arith.addf %16, %18 : vector<8x128xf32>
    %cst_17 = arith.constant 0.000000e+00 : f32
    %20 = vector.broadcast %cst_17 : f32 to vector<8x128xf32>
    %21 = arith.maximumf %19, %20 : vector<8x128xf32>
    %c0_18 = arith.constant 0 : index
    %c0_19 = arith.constant 0 : index
    %22 = vector.load %arg8[%c0_18, %c0_19] : memref<128x128xf32, #tpu.memory_space<vmem>>, vector<128x128xf32>
    %cst_20 = arith.constant dense<0.000000e+00> : vector<8x128xf32>
    %23 = tpu.matmul %21, %22, %cst_20 {dimension_numbers = #tpu.dot_dimension_numbers<[1], [0], [0], [1], [0, 0, 1, 1], [], []>} : vector<8x128xf32>, vector<128x128xf32>, vector<8x128xf32> -> vector<8x128xf32>
    %c0_21 = arith.constant 0 : index
    %c0_22 = arith.constant 0 : index
    %24 = vector.load %arg9[%c0_21, %c0_22] : memref<1x128xf32, #tpu.memory_space<vmem>>, vector<1x128xf32>
    %25 = vector.broadcast %24 : vector<1x128xf32> to vector<8x128xf32>
    %26 = arith.addf %23, %25 : vector<8x128xf32>
    %cst_23 = arith.constant 0.000000e+00 : f32
    %27 = vector.broadcast %cst_23 : f32 to vector<8x128xf32>
    %28 = arith.maximumf %26, %27 : vector<8x128xf32>
    %c0_24 = arith.constant 0 : index
    %c0_25 = arith.constant 0 : index
    %29 = vector.load %arg10[%c0_24, %c0_25] : memref<128x128xf32, #tpu.memory_space<vmem>>, vector<128x128xf32>
    %cst_26 = arith.constant dense<0.000000e+00> : vector<8x128xf32>
    %30 = tpu.matmul %28, %29, %cst_26 {dimension_numbers = #tpu.dot_dimension_numbers<[1], [0], [0], [1], [0, 0, 1, 1], [], []>} : vector<8x128xf32>, vector<128x128xf32>, vector<8x128xf32> -> vector<8x128xf32>
    %c0_27 = arith.constant 0 : index
    %c0_28 = arith.constant 0 : index
    %31 = vector.load %arg11[%c0_27, %c0_28] : memref<1x128xf32, #tpu.memory_space<vmem>>, vector<1x128xf32>
    %32 = vector.broadcast %31 : vector<1x128xf32> to vector<8x128xf32>
    %33 = arith.addf %30, %32 : vector<8x128xf32>
    %34 = tpu.iota {dimensions = array<i32: 1>} : vector<8x128xi32>
    %c4_i32 = arith.constant 4 : i32
    %35 = vector.broadcast %c4_i32 : i32 to vector<8x128xi32>
    %36 = arith.cmpi sge, %34, %35 : vector<8x128xi32>
    %c8_i32 = arith.constant 8 : i32
    %37 = vector.broadcast %c8_i32 : i32 to vector<8x128xi32>
    %38 = arith.cmpi slt, %34, %37 : vector<8x128xi32>
    %39 = arith.andi %36, %38 : vector<8x128xi1>
    %cst_29 = arith.constant -2.000000e+01 : f32
    %cst_30 = arith.constant 2.000000e+00 : f32
    %40 = vector.broadcast %cst_29 : f32 to vector<8x128xf32>
    %41 = arith.maximumf %40, %33 : vector<8x128xf32>
    %42 = vector.broadcast %cst_30 : f32 to vector<8x128xf32>
    %43 = arith.minimumf %42, %41 : vector<8x128xf32>
    %44 = arith.select %39, %43, %33 : vector<8x128xi1>, vector<8x128xf32>
    %c0_31 = arith.constant 0 : index
    %c0_32 = arith.constant 0 : index
    %45 = vector.load %arg12[%c0_31, %c0_32] : memref<8x128xf32, #tpu.memory_space<vmem>>, vector<8x128xf32>
    tpu.vector_store %arg12[%c0_31, %c0_32], %44 {strides = array<i32>} : memref<8x128xf32, #tpu.memory_space<vmem>>, vector<8x128xf32>,
    return
  }
  func.func @transform_0(%arg0: i32) -> (i32, i32) {
    %c0_i32 = arith.constant 0 : i32
    %c0_i32_0 = arith.constant 0 : i32
    return %arg0, %c0_i32 : i32, i32
  }
  func.func @transform_1(%arg0: i32) -> (i32, i32) {
    %c0_i32 = arith.constant 0 : i32
    %c0_i32_0 = arith.constant 0 : i32
    %c0_i32_1 = arith.constant 0 : i32
    return %c0_i32, %c0_i32_0 : i32, i32
  }
  func.func @transform_2(%arg0: i32) -> (i32, i32) {
    %c0_i32 = arith.constant 0 : i32
    %c0_i32_0 = arith.constant 0 : i32
    %c0_i32_1 = arith.constant 0 : i32
    return %c0_i32, %c0_i32_0 : i32, i32
  }
  func.func @transform_3(%arg0: i32) -> (i32, i32) {
    %c0_i32 = arith.constant 0 : i32
    %c0_i32_0 = arith.constant 0 : i32
    %c0_i32_1 = arith.constant 0 : i32
    return %c0_i32, %c0_i32_0 : i32, i32
  }
  func.func @transform_4(%arg0: i32) -> (i32, i32) {
    %c0_i32 = arith.constant 0 : i32
    %c0_i32_0 = arith.constant 0 : i32
    %c0_i32_1 = arith.constant 0 : i32
    return %c0_i32, %c0_i32_0 : i32, i32
  }
  func.func @transform_5(%arg0: i32) -> (i32, i32) {
    %c0_i32 = arith.constant 0 : i32
    %c0_i32_0 = arith.constant 0 : i32
    %c0_i32_1 = arith.constant 0 : i32
    return %c0_i32, %c0_i32_0 : i32, i32
  }
  func.func @transform_6(%arg0: i32) -> (i32, i32) {
    %c0_i32 = arith.constant 0 : i32
    %c0_i32_0 = arith.constant 0 : i32
    %c0_i32_1 = arith.constant 0 : i32
    return %c0_i32, %c0_i32_0 : i32, i32
  }
  func.func @transform_7(%arg0: i32) -> (i32, i32) {
    %c0_i32 = arith.constant 0 : i32
    %c0_i32_0 = arith.constant 0 : i32
    %c0_i32_1 = arith.constant 0 : i32
    return %c0_i32, %c0_i32_0 : i32, i32
  }
  func.func @transform_8(%arg0: i32) -> (i32, i32) {
    %c0_i32 = arith.constant 0 : i32
    %c0_i32_0 = arith.constant 0 : i32
    %c0_i32_1 = arith.constant 0 : i32
    return %c0_i32, %c0_i32_0 : i32, i32
  }
  func.func @transform_9(%arg0: i32) -> (i32, i32) {
    %c0_i32 = arith.constant 0 : i32
    %c0_i32_0 = arith.constant 0 : i32
    %c0_i32_1 = arith.constant 0 : i32
    return %c0_i32, %c0_i32_0 : i32, i32
  }
  func.func @transform_10(%arg0: i32) -> (i32, i32) {
    %c0_i32 = arith.constant 0 : i32
    %c0_i32_0 = arith.constant 0 : i32
    %c0_i32_1 = arith.constant 0 : i32
    return %c0_i32, %c0_i32_0 : i32, i32
  }
  func.func @transform_11(%arg0: i32) -> (i32, i32) {
    %c0_i32 = arith.constant 0 : i32
    %c0_i32_0 = arith.constant 0 : i32
    return %arg0, %c0_i32 : i32, i32
  }
}

</mosaic_0001>

<bundles_post_ra>
// kernel: tpu_custom_call.1
= control target key start
LH: loop header
LB: loop body
LE: loop exit
PB: predicated region body
PF: predicated region fallthrough
CT: control target
= control target key end

     0   :  { %16 = vsyncpa [#allocation3], 0  ;;  %s677_s0 = inlined_call_operand.hbm [shape: f32[8,128], index: 0, kind: input, shape index: {}]   ;;  %s678_s1 = inlined_call_operand.hbm [shape: f32[128,128], index: 1, kind: input, shape index: {}]   ;;  %s679_s2 = inlined_call_operand.vmem [shape: f32[1,128], index: 2, kind: input, shape index: {}]   ;;  %s680_s3 = inlined_call_operand.hbm [shape: f32[128,128], index: 3, kind: input, shape index: {}]   ;;  %s681_s4 = inlined_call_operand.vmem [shape: f32[1,128], index: 4, kind: input, shape index: {}]   ;;  %s682_s5 = inlined_call_operand.hbm [shape: f32[128,128], index: 5, kind: input, shape index: {}]   ;;  %s683_s6 = inlined_call_operand.vmem [shape: f32[1,128], index: 6, kind: input, shape index: {}]   ;;  %s684_s7 = inlined_call_operand.hbm [shape: f32[128,128], index: 7, kind: input, shape index: {}]   ;;  %s685_s8 = inlined_call_operand.vmem [shape: f32[1,128], index: 8, kind: input, shape index: {}]   ;;  %s686_s9 = inlined_call_operand.hbm [shape: f32[128,128], index: 9, kind: input, shape index: {}]   ;;  %s687_s10 = inlined_call_operand.vmem [shape: f32[1,128], index: 10, kind: input, shape index: {}]   ;;  %s688_s11 = inlined_call_operand.hbm [shape: f32[8,128], index: 11, kind: output, shape index: {}]  }
   0x1   :  { %17 = vsyncpa [#allocation6], 0 }
   0x2   :  { %18 = vsyncpa [#allocation9], 0 }
   0x3   :  { %19 = vsyncpa [#allocation12], 0  ;;  %s36_s19 = sshll.u32 %s678_s1, 4  ;;  %s37_s19 = int_to_ptr.hbm [resolvable:$true] %s36_s19 }
   0x4   :  { %20 = vsyncpa [#allocation4], 0  ;;  %s557_s20 = smov [#allocation5]   ;;  %s66_s24 = sshll.u32 %s682_s5, 4  ;;  %s67_s24 = int_to_ptr.hbm [resolvable:$true] %s66_s24 }
   0x5   :  { %s38_s21 = sshll.u32 %s557_s20, 4  ;;  %s558_s25 = smov 128   ;;  %s39_s21 = int_to_ptr.vmem [resolvable:$true] %s38_s21 }
   0x6   :  { %s559_s26 = smov 8   ;;  %s560_s27 = smov [#allocation8]  }
   0x7   :  { %44 = dma.hbm_to_vmem [thread:$0]  %s37_s19, 2048, %s39_s21, [#allocation6], %s558_s25, %s558_s25, %s559_s26  }
   0x8   :  { %s68_s28 = sshll.u32 %s560_s27, 4  ;;  %s26_s30 = sshll.u32 %s677_s0, 4  ;;  %s69_s28 = int_to_ptr.vmem [resolvable:$true] %s68_s28  ;;  %s27_s30 = int_to_ptr.hbm [resolvable:$true] %s26_s30 }
   0x9   :  { %74 = dma.hbm_to_vmem [thread:$0]  %s67_s24, 2048, %s69_s28, [#allocation9], %s558_s25, %s558_s25, %s559_s26  }
   0xa   :  { %s51_s13 = sshll.u32 %s680_s3, 4  ;;  %s561_s14 = smov [#allocation2]   ;;  %s52_s13 = int_to_ptr.hbm [resolvable:$true] %s51_s13 }
   0xb   :  { %s28_s15 = sshll.u32 %s561_s14, 4  ;;  %s562_s16 = smov [#allocation7]   ;;  %s29_s15 = int_to_ptr.vmem [resolvable:$true] %s28_s15 }
   0xc   :  { %31 = dma.hbm_to_vmem [thread:$0]  %s27_s30, 128, %s29_s15, [#allocation3]  }
   0xd   :  { %s53_s17 = sshll.u32 %s562_s16, 4  ;;  %s81_s0 = sshll.u32 %s684_s7, 4  ;;  %s54_s17 = int_to_ptr.vmem [resolvable:$true] %s53_s17  ;;  %s82_s0 = int_to_ptr.hbm [resolvable:$true] %s81_s0 }
   0xe   :  { %59 = dma.hbm_to_vmem [thread:$0]  %s52_s13, 2048, %s54_s17, [#allocation6], %s558_s25, %s558_s25, %s559_s26  }
   0xf   :  { %s96_s3 = sshll.u32 %s686_s9, 4  ;;  %s563_s22 = smov [#allocation10]   ;;  %s97_s3 = int_to_ptr.hbm [resolvable:$true] %s96_s3 }
  0x10   :  { %s83_s23 = sshll.u32 %s563_s22, 4  ;;  %s564_s24 = smov [#allocation11]   ;;  %s84_s23 = int_to_ptr.vmem [resolvable:$true] %s83_s23 }
  0x11   :  { %89 = dma.hbm_to_vmem [thread:$0]  %s82_s0, 2048, %s84_s23, [#allocation9], %s558_s25, %s558_s25, %s559_s26  }
  0x12   :  { %s98_s7 = sshll.u32 %s564_s24, 4  ;;  %s99_s7 = int_to_ptr.vmem [resolvable:$true] %s98_s7 }
  0x13   :  { %104 = dma.hbm_to_vmem [thread:$0]  %s97_s3, 2048, %s99_s7, [#allocation12], %s558_s25, %s558_s25, %s559_s26  }
  0x14   :  { %547 = dma.done.wait [#allocation3], 128  }
  0x15   :  { %548 = vsyncadd [#allocation3], 4294967168 }
  0x16   :  { %549 = dma.done.wait [#allocation6], 4096  }
  0x17   :  { %550 = vsyncadd [#allocation6], 4294963200 }
  0x18   :  { %551 = dma.done.wait [#allocation9], 4096  }
  0x19   :  { %552 = vsyncadd [#allocation9], 4294963200 }
  0x1a   :  { %553 = dma.done.wait [#allocation12], 2048  }
  0x1b   :  { %554 = vsyncadd [#allocation12], 4294965248  ;;  %v147_v0 = vld [vmem:[#allocation5 + $0x78] sm:$0xff]  ;;  %v146_v1 = vld [vmem:[#allocation5 + $0x70] sm:$0xff]  ;;  %s565_s30 = smov [#allocation13]  }
  0x1c   :  { %152 = vmatpush.msra.mxu0 %v147_v0  ;;  %v145_v2 = vld [vmem:[#allocation5 + $0x68] sm:$0xff]  ;;  %v144_v3 = vld [vmem:[#allocation5 + $0x60] sm:$0xff]  ;;  %v188_v4 = vld [vmem:[#allocation7 + $0x78] sm:$0xff]  ;;  %s350_s5 = sshll.u32 %s565_s30, 4  ;;  %s351_s5 = int_to_ptr.vmem [resolvable:$true] %s350_s5 }
  0x1d   :  { %v143_v5 = vld [vmem:[#allocation5 + $0x58] sm:$0xff]  ;;  %193 = vmatpush.msra.mxu1 %v188_v4  ;;  %v187_v6 = vld [vmem:[#allocation7 + $0x70] sm:$0xff]  ;;  %v186_v7 = vld [vmem:[#allocation7 + $0x68] sm:$0xff] }
  0x1e   :  { %153 = vmatpush.msra.mxu0 %v146_v1  ;;  %v142_v8 = vld [vmem:[#allocation5 + $0x50] sm:$0xff]  ;;  %v141_v9 = vld [vmem:[#allocation5 + $0x48] sm:$0xff]  ;;  %v185_v10 = vld [vmem:[#allocation7 + $0x60] sm:$0xff] }
  0x1f   :  { %194 = vmatpush.msra.mxu1 %v187_v6  ;;  %v184_v11 = vld [vmem:[#allocation7 + $0x58] sm:$0xff]  ;;  %v140_v12 = vld [vmem:[#allocation5 + $0x40] sm:$0xff]  ;;  %v183_v13 = vld [vmem:[#allocation7 + $0x50] sm:$0xff] }
  0x20   :  { %154 = vmatpush.msra.mxu0 %v145_v2  ;;  %v139_v14 = vld [vmem:[#allocation5 + $0x38] sm:$0xff]  ;;  %v182_v15 = vld [vmem:[#allocation7 + $0x48] sm:$0xff]  ;;  %v138_v16 = vld [vmem:[#allocation5 + $0x30] sm:$0xff] }
  0x21   :  { %195 = vmatpush.msra.mxu1 %v186_v7  ;;  %v181_v17 = vld [vmem:[#allocation7 + $0x40] sm:$0xff]  ;;  %v137_v18 = vld [vmem:[#allocation5 + $0x28] sm:$0xff]  ;;  %v180_v19 = vld [vmem:[#allocation7 + $0x38] sm:$0xff] }
  0x22   :  { %155 = vmatpush.msra.mxu0 %v144_v3  ;;  %v136_v20 = vld [vmem:[#allocation5 + $0x20] sm:$0xff]  ;;  %v179_v21 = vld [vmem:[#allocation7 + $0x30] sm:$0xff]  ;;  %v135_v22 = vld [vmem:[#allocation5 + $0x18] sm:$0xff] }
  0x23   :  { %196 = vmatpush.msra.mxu1 %v185_v10  ;;  %v178_v23 = vld [vmem:[#allocation7 + $0x28] sm:$0xff]  ;;  %v134_v24 = vld [vmem:[#allocation5 + $0x10] sm:$0xff]  ;;  %v177_v25 = vld [vmem:[#allocation7 + $0x20] sm:$0xff] }
  0x24   :  { %156 = vmatpush.msra.mxu0 %v143_v5  ;;  %v133_v26 = vld [vmem:[#allocation5 + $0x8] sm:$0xff]  ;;  %v176_v27 = vld [vmem:[#allocation7 + $0x18] sm:$0xff]  ;;  %v132_v28 = vld [vmem:[#allocation5] sm:$0xff] }
  0x25   :  { %197 = vmatpush.msra.mxu1 %v184_v11  ;;  %v131_v29 = vld [vmem:[#allocation2] sm:$0xff]  ;;  %v175_v30 = vld [vmem:[#allocation7 + $0x10] sm:$0xff]  ;;  %v174_v31 = vld [vmem:[#allocation7 + $0x8] sm:$0xff] }
  0x26   :  { %157 = vmatpush.msra.mxu0 %v142_v8  ;;  %v173_v32 = vld [vmem:[#allocation7] sm:$0xff]  ;;  %v229_v33 = vld [vmem:[#allocation8 + $0x78] sm:$0xff]  ;;  %v228_v34 = vld [vmem:[#allocation8 + $0x70] sm:$0xff] }
  0x27   :  { %198 = vmatpush.msra.mxu1 %v183_v13  ;;  %234 = vmatpush.msra.mxu2 %v229_v33  ;;  %v227_v35 = vld [vmem:[#allocation8 + $0x68] sm:$0xff]  ;;  %v226_v36 = vld [vmem:[#allocation8 + $0x60] sm:$0xff]  ;;  %v225_v37 = vld [vmem:[#allocation8 + $0x58] sm:$0xff]  ;;  %v336_v33 = vlaneseq }
  0x28   :  { %158 = vmatpush.msra.mxu0 %v141_v9  ;;  %v224_v38 = vld [vmem:[#allocation8 + $0x50] sm:$0xff]  ;;  %v223_v39 = vld [vmem:[#allocation8 + $0x48] sm:$0xff]  ;;  %v222_v40 = vld [vmem:[#allocation8 + $0x40] sm:$0xff] }
  0x29   :  { %199 = vmatpush.msra.mxu1 %v182_v15  ;;  %235 = vmatpush.msra.mxu2 %v228_v34  ;;  %v221_v41 = vld [vmem:[#allocation8 + $0x38] sm:$0xff]  ;;  %v220_v42 = vld [vmem:[#allocation8 + $0x30] sm:$0xff]  ;;  %v219_v43 = vld [vmem:[#allocation8 + $0x28] sm:$0xff] }
  0x2a   :  { %159 = vmatpush.msra.mxu0 %v140_v12  ;;  %v218_v44 = vld [vmem:[#allocation8 + $0x20] sm:$0xff]  ;;  %v217_v45 = vld [vmem:[#allocation8 + $0x18] sm:$0xff]  ;;  %v216_v50 = vld [vmem:[#allocation8 + $0x10] sm:$0xff] }
  0x2b   :  { %200 = vmatpush.msra.mxu1 %v181_v17  ;;  %236 = vmatpush.msra.mxu2 %v227_v35  ;;  %v374_v46 = vld [vmem:[%s679_s2] ss:$0 sm:$0xff]  ;;  %v215_v51 = vld [vmem:[#allocation8 + $0x8] sm:$0xff]  ;;  %v214_v52 = vld [vmem:[#allocation8] sm:$0xff]  ;;  %v337_v35 = vand.u32 127, %v336_v33 }
  0x2c   :  { %160 = vmatpush.msra.mxu0 %v139_v14  ;;  %v270_v53 = vld [vmem:[#allocation10 + $0x78] sm:$0xff]  ;;  %v269_v54 = vld [vmem:[#allocation10 + $0x70] sm:$0xff]  ;;  %v268_v55 = vld [vmem:[#allocation10 + $0x68] sm:$0xff] }
  0x2d   :  { %201 = vmatpush.msra.mxu1 %v180_v19  ;;  %237 = vmatpush.msra.mxu2 %v226_v36  ;;  %v267_v56 = vld [vmem:[#allocation10 + $0x60] sm:$0xff]  ;;  %v266_v57 = vld [vmem:[#allocation10 + $0x58] sm:$0xff]  ;;  %v265_v58 = vld [vmem:[#allocation10 + $0x50] sm:$0xff]  ;;  %vm338_vm0 = vcmp.ge.s32.totalorder %v337_v35, 4  ;;  %vm339_vm1 = vcmp.lt.s32.totalorder %v337_v35, 8 }
  0x2e   :  { %161 = vmatpush.msra.mxu0 %v138_v16  ;;  %275 = vmatpush.msra.mxu3 %v270_v53  ;;  %v264_v59 = vld [vmem:[#allocation10 + $0x48] sm:$0xff]  ;;  %v263_v60 = vld [vmem:[#allocation10 + $0x40] sm:$0xff]  ;;  %v262_v61 = vld [vmem:[#allocation10 + $0x38] sm:$0xff] }
  0x2f   :  { %202 = vmatpush.msra.mxu1 %v179_v21  ;;  %238 = vmatpush.msra.mxu2 %v225_v37  ;;  %v261_v62 = vld [vmem:[#allocation10 + $0x30] sm:$0xff]  ;;  %v260_v63 = vld [vmem:[#allocation10 + $0x28] sm:$0xff]  ;;  %v259_v0 = vld [vmem:[#allocation10 + $0x20] sm:$0xff] }
  0x30   :  { %162 = vmatpush.msra.mxu0 %v137_v18  ;;  %276 = vmatpush.msra.mxu3 %v269_v54  ;;  %v258_v1 = vld [vmem:[#allocation10 + $0x18] sm:$0xff]  ;;  %v257_v6 = vld [vmem:[#allocation10 + $0x10] sm:$0xff]  ;;  %v256_v7 = vld [vmem:[#allocation10 + $0x8] sm:$0xff] }
  0x31   :  { %203 = vmatpush.msra.mxu1 %v178_v23  ;;  %239 = vmatpush.msra.mxu2 %v224_v38  ;;  %v375_v2 = vld [vmem:[%s681_s4] ss:$0 sm:$0xff]  ;;  %v255_v8 = vld [vmem:[#allocation10] sm:$0xff]  ;;  %v310_v10 = vld [vmem:[#allocation11 + $0x70] sm:$0xff] }
  0x32   :  { %163 = vmatpush.msra.mxu0 %v136_v20  ;;  %277 = vmatpush.msra.mxu3 %v268_v55  ;;  %v311_v9 = vld [vmem:[#allocation11 + $0x78] sm:$0xff]  ;;  %v309_v11 = vld [vmem:[#allocation11 + $0x68] sm:$0xff]  ;;  %v308_v12 = vld [vmem:[#allocation11 + $0x60] sm:$0xff] }
  0x33   :  { %204 = vmatpush.msra.mxu1 %v177_v25  ;;  %240 = vmatpush.msra.mxu2 %v223_v39  ;;  %v307_v13 = vld [vmem:[#allocation11 + $0x58] sm:$0xff]  ;;  %v306_v14 = vld [vmem:[#allocation11 + $0x50] sm:$0xff]  ;;  %v305_v15 = vld [vmem:[#allocation11 + $0x48] sm:$0xff] }
  0x34   :  { %164 = vmatpush.msra.mxu0 %v135_v22  ;;  %278 = vmatpush.msra.mxu3 %v267_v56  ;;  %v304_v16 = vld [vmem:[#allocation11 + $0x40] sm:$0xff]  ;;  %v303_v17 = vld [vmem:[#allocation11 + $0x38] sm:$0xff]  ;;  %v302_v18 = vld [vmem:[#allocation11 + $0x30] sm:$0xff] }
  0x35   :  { %205 = vmatpush.msra.mxu1 %v176_v27  ;;  %241 = vmatpush.msra.mxu2 %v222_v40  ;;  %v301_v19 = vld [vmem:[#allocation11 + $0x28] sm:$0xff]  ;;  %v300_v20 = vld [vmem:[#allocation11 + $0x20] sm:$0xff]  ;;  %v299_v21 = vld [vmem:[#allocation11 + $0x18] sm:$0xff] }
  0x36   :  { %165 = vmatpush.msra.mxu0 %v134_v24  ;;  %279 = vmatpush.msra.mxu3 %v266_v57  ;;  %v376_v22 = vld [vmem:[%s683_s6] ss:$0 sm:$0xff]  ;;  %v297_v27 = vld [vmem:[#allocation11 + $0x8] sm:$0xff]  ;;  %vm340_vm2 = vmand %vm338_vm0, %vm339_vm1 }
  0x37   :  { %206 = vmatpush.msra.mxu1 %v175_v30  ;;  %242 = vmatpush.msra.mxu2 %v221_v41  ;;  %v378_v34 = vld [vmem:[%s687_s10] ss:$0 sm:$0xff] }
  0x38   :  { %166 = vmatpush.msra.mxu0 %v133_v26  ;;  %280 = vmatpush.msra.mxu3 %v265_v58  ;;  %v298_v26 = vld [vmem:[#allocation11 + $0x10] sm:$0xff] }
  0x39   :  { %207 = vmatpush.msra.mxu1 %v174_v31  ;;  %243 = vmatpush.msra.mxu2 %v220_v42 }
  0x3a   :  { %167 = vmatpush.msra.mxu0 %v132_v28  ;;  %281 = vmatpush.msra.mxu3 %v264_v59  ;;  %v296_v28 = vld [vmem:[#allocation11] sm:$0xff] }
  0x3b   :  { %168 = vmatmul.f32.vlgmr.msra.gmra.mxu0 %v131_v29  ;;  %208 = vmatpush.msra.mxu1 %v173_v32  ;;  %v377_v29 = vld [vmem:[%s685_s8] ss:$0 sm:$0xff]  ;;  %s352_s8 = sshll.u32 %s688_s11, 4  ;;  %s353_s8 = int_to_ptr.hbm [resolvable:$true] %s352_s8 }
  0x3c   :  { %244 = vmatpush.msra.mxu2 %v219_v43  ;;  %282 = vmatpush.msra.mxu3 %v263_v60 }
  0x3d   :  { %316 = vmatpush.msrb.mxu0 %v311_v9 }
  0x3e   :  { %245 = vmatpush.msra.mxu2 %v218_v44  ;;  %283 = vmatpush.msra.mxu3 %v262_v61 }
  0x3f   :  { %317 = vmatpush.msrb.mxu0 %v310_v10 }
  0x40   :  { %246 = vmatpush.msra.mxu2 %v217_v45  ;;  %284 = vmatpush.msra.mxu3 %v261_v62 }
  0x41   :  { %318 = vmatpush.msrb.mxu0 %v309_v11 }
  0x42   :  { %247 = vmatpush.msra.mxu2 %v216_v50  ;;  %285 = vmatpush.msra.mxu3 %v260_v63 }
  0x43   :  { %319 = vmatpush.msrb.mxu0 %v308_v12 }
  0x44   :  { %248 = vmatpush.msra.mxu2 %v215_v51  ;;  %286 = vmatpush.msra.mxu3 %v259_v0 }
  0x45   :  { %320 = vmatpush.msrb.mxu0 %v307_v13 }
  0x46   :  { %249 = vmatpush.msra.mxu2 %v214_v52  ;;  %287 = vmatpush.msra.mxu3 %v258_v1 }
  0x47   :  { %321 = vmatpush.msrb.mxu0 %v306_v14 }
  0x48   :  { %288 = vmatpush.msra.mxu3 %v257_v6 }
  0x49   :  { %322 = vmatpush.msrb.mxu0 %v305_v15 }
  0x4a   :  { %289 = vmatpush.msra.mxu3 %v256_v7 }
  0x4b   :  { %323 = vmatpush.msrb.mxu0 %v304_v16 }
  0x4c   :  { %290 = vmatpush.msra.mxu3 %v255_v8 }
  0x4d   :  { %324 = vmatpush.msrb.mxu0 %v303_v17 }
  0x4f   :  { %325 = vmatpush.msrb.mxu0 %v302_v18 }
  0x51   :  { %326 = vmatpush.msrb.mxu0 %v301_v19 }
  0x53   :  { %327 = vmatpush.msrb.mxu0 %v300_v20 }
  0x55   :  { %328 = vmatpush.msrb.mxu0 %v299_v21 }
  0x57   :  { %329 = vmatpush.msrb.mxu0 %v298_v26 }
  0x59   :  { %330 = vmatpush.msrb.mxu0 %v297_v27 }
  0x5b   :  { %331 = vmatpush.msrb.mxu0 %v296_v28 }
  0xb8   :  { %v169_v47 = vpop.f32.mrf.mxu0 }
  0xb9   :  { %v170_v48 = vadd.f32 %v374_v46, %v169_v47 }
  0xbb   :  { %v172_v49 = vmax.f32 %v170_v48, 0.0 }
  0xbd   :  { %209 = vmatmul.f32.vlgmr.msra.gmra.mxu1 %v172_v49 }
 0x13a   :  { %v210_v3 = vpop.f32.mrf.mxu1 }
 0x13b   :  { %v211_v4 = vadd.f32 %v375_v2, %v210_v3 }
 0x13d   :  { %v213_v5 = vmax.f32 %v211_v4, 0.0 }
 0x13f   :  { %250 = vmatmul.f32.vlgmr.msra.gmra.mxu2 %v213_v5 }
 0x1c2   :  { %v251_v23 = vpop.f32.mrf.mxu2 }
 0x1c3   :  { %v252_v24 = vadd.f32 %v376_v22, %v251_v23 }
 0x1c5   :  { %v254_v25 = vmax.f32 %v252_v24, 0.0 }
 0x1c7   :  { %291 = vmatmul.f32.vlgmr.msra.gmra.mxu3 %v254_v25 }
 0x24a   :  { %v292_v30 = vpop.f32.mrf.mxu3 }
 0x24b   :  { %v293_v31 = vadd.f32 %v377_v29, %v292_v30 }
 0x24d   :  { %v295_v32 = vmax.f32 %v293_v31, 0.0 }
 0x24f   :  { %332 = vmatmul.f32.vlgmr.msrb.gmra.mxu0 %v295_v32 }
 0x2cc   :  { %v333_v36 = vpop.f32.mrf.mxu0 }
 0x2cd   :  { %v334_v37 = vadd.f32 %v378_v34, %v333_v36 }
 0x2cf   :  { %v341_v38 = vmax.f32 %v334_v37, -20.0 }
 0x2d1   :  { %v342_v39 = vmin.f32 %v341_v38, 2.0 }
 0x2d3   :  { %v343_v40 = vsel %vm340_vm2, %v342_v39, %v334_v37 }
 0x2d4   :  { %344 = vst [vmem:[#allocation13] sm:$0xff] %v343_v40 }
 0x2d5   :  { %355 = dma.vmem_to_hbm [thread:$0]  %s351_s5, 128, %s353_s8, [#allocation4]  }
 0x2d6   :  { %555 = dma.done.wait [#allocation4], 128  }
 0x2d7   :  { %556 = vsyncadd [#allocation4], 4294967168 }
 0x2d8   :  { %360 = vsyncpa [#allocation3], 1 }
 0x2d9   :  { %361 = vsyncpa [#allocation6], 1 }
 0x2da   :  { %362 = vsyncpa [#allocation9], 1 }
 0x2db   :  { %363 = vsyncpa [#allocation12], 1 }
 0x2dc   :  { %364 = vsyncpa [#allocation4], 1 }

</bundles_post_ra>
